<compile_context>
chip_gen: v7x
topology: tpu7x:2x2x1
jax: 0.10.0
libtpu: 0.0.40
codegen_flags: <defaults>
</compile_context>

<pallas_src>
import jax
import jax.numpy as jnp
from jax.experimental import pallas as pl
from jax.experimental.pallas import tpu as pltpu

LANE = 128  # vreg lane width; all hidden/output dims are padded to this.


def mlp_kernel(x_ref, w1_ref, b1_ref, w2_ref, b2_ref, w3_ref, b3_ref,
               w4_ref, b4_ref, o_ref):
    # x: (TB, 784) -> (TB, 128) -> (TB, 128) -> (TB, 128) -> (TB, 128)
    x = x_ref[...]
    h = jax.nn.sigmoid(
        jnp.dot(x, w1_ref[...], preferred_element_type=jnp.float32) + b1_ref[...])
    h = jax.nn.sigmoid(
        jnp.dot(h, w2_ref[...], preferred_element_type=jnp.float32) + b2_ref[...])
    h = jax.nn.sigmoid(
        jnp.dot(h, w3_ref[...], preferred_element_type=jnp.float32) + b3_ref[...])
    logits = jnp.dot(h, w4_ref[...], preferred_element_type=jnp.float32) + b4_ref[...]
    o_ref[...] = logits.astype(o_ref.dtype)


def _pad_weight(w, rows, cols):
    """Zero-pad a (in, out) weight to (rows, cols); zero rows/cols are inert."""
    return jnp.zeros((rows, cols), w.dtype).at[:w.shape[0], :w.shape[1]].set(w)


def _pad_bias(b, cols):
    return jnp.zeros((1, cols), b.dtype).at[:, :b.shape[1]].set(b)


def our_mlp_forward(x_nchw, params, *, tb=None):
    """x_nchw: (B, 1, 28, 28) float32. Returns logits (B, 10)."""
    B = x_nchw.shape[0]
    x_flat = x_nchw.reshape(B, -1)          # nn.Flatten(): (B, 784)
    d_in = x_flat.shape[1]                  # 784
    (w1, b1, w2, b2, w3, b3, w4, b4) = params

    # Lane-dense padding of every layer width (50/100/50/10 -> 128).
    w1p, b1p = _pad_weight(w1, d_in, LANE), _pad_bias(b1, LANE)
    w2p, b2p = _pad_weight(w2, LANE, LANE), _pad_bias(b2, LANE)
    w3p, b3p = _pad_weight(w3, LANE, LANE), _pad_bias(b3, LANE)
    w4p, b4p = _pad_weight(w4, LANE, LANE), _pad_bias(b4, LANE)
    n_out = w4.shape[1]                     # 10 (true logits width)

    # Batch tile: 256 fills the v6e/v7x MXU M-dim (128 also saturates v5e);
    # for tiny batches just round up to the 8-sublane minimum so we don't pad
    # a 2-row batch to 256 rows of dead work.
    if tb is None:
        tb = 256 if B >= 256 else max(8, ((B + 7) // 8) * 8)
    b_pad = pl.cdiv(B, tb) * tb
    if b_pad != B:
        x_flat = jnp.zeros((b_pad, d_in), x_flat.dtype).at[:B].set(x_flat)
    grid = (b_pad // tb,)

    # x / out tiles walk the batch grid; weights & biases use a constant block
    # index so they stay VMEM-resident across grid steps (no re-DMA).
    resident = lambda shape: pl.BlockSpec(shape, lambda i: (0, 0))
    in_specs = [
        pl.BlockSpec((tb, d_in), lambda i: (i, 0)),
        resident(w1p.shape), resident(b1p.shape),
        resident(w2p.shape), resident(b2p.shape),
        resident(w3p.shape), resident(b3p.shape),
        resident(w4p.shape), resident(b4p.shape),
    ]
    out_spec = pl.BlockSpec((tb, LANE), lambda i: (i, 0))

    # Advisory cost hint for XLA's scheduler (padded shapes).
    flops = 2 * b_pad * (d_in * LANE + 3 * LANE * LANE)
    transcendentals = 3 * b_pad * LANE                       # sigmoids
    weight_bytes = sum(int(a.size) * a.dtype.itemsize
                       for a in (w1p, b1p, w2p, b2p, w3p, b3p, w4p, b4p))
    bytes_accessed = (b_pad * d_in * 4) + weight_bytes + (b_pad * LANE * 4)

    out_padded = pl.pallas_call(
        mlp_kernel,
        out_shape=jax.ShapeDtypeStruct((b_pad, LANE), jnp.float32),
        grid=grid,
        in_specs=in_specs,
        out_specs=out_spec,
        compiler_params=pltpu.CompilerParams(
            dimension_semantics=("parallel",)),
        cost_estimate=pl.CostEstimate(
            flops=flops,
            transcendentals=transcendentals,
            bytes_accessed=bytes_accessed),
    )(x_flat, w1p, b1p, w2p, b2p, w3p, b3p, w4p, b4p)

    # Strip batch padding and the zero logit columns.
    return out_padded[:B, :n_out]


def init_params(key):
    """Deterministic init matching PyTorch nn.Linear shapes.
    PyTorch stores W as (out, in) and computes x @ W.T + b; we store weights
    as (in, out) so the kernel does x @ W + b (same math)."""
    sizes = [(28 * 28, 50), (50, 100), (100, 50), (50, 10)]
    params = []
    for fan_in, fan_out in sizes:
        kw, kb, key = jax.random.split(key, 3)
        bound = 1.0 / jnp.sqrt(fan_in)
        w = jax.random.uniform(kw, (fan_in, fan_out), jnp.float32, -bound, bound)
        b = jax.random.uniform(kb, (1, fan_out), jnp.float32, -bound, bound)
        params.extend([w, b])
    return tuple(params)


def reference_forward(x_nchw, params):
    (w1, b1, w2, b2, w3, b3, w4, b4) = params
    x = x_nchw.reshape(x_nchw.shape[0], -1)
    h = jax.nn.sigmoid(x @ w1 + b1)
    h = jax.nn.sigmoid(h @ w2 + b2)
    h = jax.nn.sigmoid(h @ w3 + b3)
    return h @ w4 + b4


if __name__ == "__main__":
    key = jax.random.PRNGKey(0)
    kx, kp = jax.random.split(key)
    x = jax.random.normal(kx, (2, 1, 28, 28), jnp.float32)  # NCHW, like MNIST
    params = init_params(kp)

    logits = our_mlp_forward(x, params)
    jax.block_until_ready(logits)

    ref = reference_forward(x, params)
    assert logits.shape == (2, 10)
    assert jnp.allclose(logits, ref, atol=1e-5, rtol=1e-5)
    print("KERNEL_OK")
</pallas_src>

<mosaic_0001>
module attributes {stable_mosaic.version = 11 : i64} {
  func.func @mlp_kernel(%arg0: i32, %arg1: memref<8x784xf32, #tpu.memory_space<vmem>>, %arg2: memref<784x128xf32, #tpu.memory_space<vmem>>, %arg3: memref<1x128xf32, #tpu.memory_space<vmem>>, %arg4: memref<128x128xf32, #tpu.memory_space<vmem>>, %arg5: memref<1x128xf32, #tpu.memory_space<vmem>>, %arg6: memref<128x128xf32, #tpu.memory_space<vmem>>, %arg7: memref<1x128xf32, #tpu.memory_space<vmem>>, %arg8: memref<128x128xf32, #tpu.memory_space<vmem>>, %arg9: memref<1x128xf32, #tpu.memory_space<vmem>>, %arg10: memref<8x128xf32, #tpu.memory_space<vmem>>) attributes {dimension_semantics = [#tpu.dimension_semantics<parallel>], iteration_bounds = array<i64: 1>, scalar_prefetch = 0 : i64, scratch_operands = 0 : i64, tpu.core_type = #tpu.core_type<tc>, window_params = [{transform_indices = @transform_0, window_bounds = array<i64: 8, 784>}, {pipeline_mode = #tpu.pipeline_mode<synchronous>, transform_indices = @transform_1, window_bounds = array<i64: 784, 128>}, {pipeline_mode = #tpu.pipeline_mode<synchronous>, transform_indices = @transform_2, window_bounds = array<i64: 1, 128>}, {pipeline_mode = #tpu.pipeline_mode<synchronous>, transform_indices = @transform_3, window_bounds = array<i64: 128, 128>}, {pipeline_mode = #tpu.pipeline_mode<synchronous>, transform_indices = @transform_4, window_bounds = array<i64: 1, 128>}, {pipeline_mode = #tpu.pipeline_mode<synchronous>, transform_indices = @transform_5, window_bounds = array<i64: 128, 128>}, {pipeline_mode = #tpu.pipeline_mode<synchronous>, transform_indices = @transform_6, window_bounds = array<i64: 1, 128>}, {pipeline_mode = #tpu.pipeline_mode<synchronous>, transform_indices = @transform_7, window_bounds = array<i64: 128, 128>}, {pipeline_mode = #tpu.pipeline_mode<synchronous>, transform_indices = @transform_8, window_bounds = array<i64: 1, 128>}, {transform_indices = @transform_9, window_bounds = array<i64: 8, 128>}]} {
    %c0 = arith.constant 0 : index
    %c0_0 = arith.constant 0 : index
    %0 = vector.load %arg1[%c0, %c0_0] : memref<8x784xf32, #tpu.memory_space<vmem>>, vector<8x784xf32>
    %c0_1 = arith.constant 0 : index
    %c0_2 = arith.constant 0 : index
    %1 = vector.load %arg2[%c0_1, %c0_2] : memref<784x128xf32, #tpu.memory_space<vmem>>, vector<784x128xf32>
    %cst = arith.constant dense<0.000000e+00> : vector<8x128xf32>
    %2 = tpu.matmul %0, %1, %cst {dimension_numbers = #tpu.dot_dimension_numbers<[1], [0], [0], [1], [0, 0, 1, 1], [], []>} : vector<8x784xf32>, vector<784x128xf32>, vector<8x128xf32> -> vector<8x128xf32>
    %c0_3 = arith.constant 0 : index
    %c0_4 = arith.constant 0 : index
    %3 = vector.load %arg3[%c0_3, %c0_4] : memref<1x128xf32, #tpu.memory_space<vmem>>, vector<1x128xf32>
    %4 = vector.broadcast %3 : vector<1x128xf32> to vector<8x128xf32>
    %5 = arith.addf %2, %4 : vector<8x128xf32>
    %6 = arith.negf %5 : vector<8x128xf32>
    %7 = math.exp %6 : vector<8x128xf32>
    %cst_5 = arith.constant 1.000000e+00 : f32
    %8 = vector.broadcast %cst_5 : f32 to vector<8x128xf32>
    %9 = arith.addf %8, %7 : vector<8x128xf32>
    %10 = arith.divf %8, %9 : vector<8x128xf32>
    %c0_6 = arith.constant 0 : index
    %c0_7 = arith.constant 0 : index
    %11 = vector.load %arg4[%c0_6, %c0_7] : memref<128x128xf32, #tpu.memory_space<vmem>>, vector<128x128xf32>
    %cst_8 = arith.constant dense<0.000000e+00> : vector<8x128xf32>
    %12 = tpu.matmul %10, %11, %cst_8 {dimension_numbers = #tpu.dot_dimension_numbers<[1], [0], [0], [1], [0, 0, 1, 1], [], []>} : vector<8x128xf32>, vector<128x128xf32>, vector<8x128xf32> -> vector<8x128xf32>
    %c0_9 = arith.constant 0 : index
    %c0_10 = arith.constant 0 : index
    %13 = vector.load %arg5[%c0_9, %c0_10] : memref<1x128xf32, #tpu.memory_space<vmem>>, vector<1x128xf32>
    %14 = vector.broadcast %13 : vector<1x128xf32> to vector<8x128xf32>
    %15 = arith.addf %12, %14 : vector<8x128xf32>
    %16 = arith.negf %15 : vector<8x128xf32>
    %17 = math.exp %16 : vector<8x128xf32>
    %cst_11 = arith.constant 1.000000e+00 : f32
    %18 = vector.broadcast %cst_11 : f32 to vector<8x128xf32>
    %19 = arith.addf %18, %17 : vector<8x128xf32>
    %20 = arith.divf %18, %19 : vector<8x128xf32>
    %c0_12 = arith.constant 0 : index
    %c0_13 = arith.constant 0 : index
    %21 = vector.load %arg6[%c0_12, %c0_13] : memref<128x128xf32, #tpu.memory_space<vmem>>, vector<128x128xf32>
    %cst_14 = arith.constant dense<0.000000e+00> : vector<8x128xf32>
    %22 = tpu.matmul %20, %21, %cst_14 {dimension_numbers = #tpu.dot_dimension_numbers<[1], [0], [0], [1], [0, 0, 1, 1], [], []>} : vector<8x128xf32>, vector<128x128xf32>, vector<8x128xf32> -> vector<8x128xf32>
    %c0_15 = arith.constant 0 : index
    %c0_16 = arith.constant 0 : index
    %23 = vector.load %arg7[%c0_15, %c0_16] : memref<1x128xf32, #tpu.memory_space<vmem>>, vector<1x128xf32>
    %24 = vector.broadcast %23 : vector<1x128xf32> to vector<8x128xf32>
    %25 = arith.addf %22, %24 : vector<8x128xf32>
    %26 = arith.negf %25 : vector<8x128xf32>
    %27 = math.exp %26 : vector<8x128xf32>
    %cst_17 = arith.constant 1.000000e+00 : f32
    %28 = vector.broadcast %cst_17 : f32 to vector<8x128xf32>
    %29 = arith.addf %28, %27 : vector<8x128xf32>
    %30 = arith.divf %28, %29 : vector<8x128xf32>
    %c0_18 = arith.constant 0 : index
    %c0_19 = arith.constant 0 : index
    %31 = vector.load %arg8[%c0_18, %c0_19] : memref<128x128xf32, #tpu.memory_space<vmem>>, vector<128x128xf32>
    %cst_20 = arith.constant dense<0.000000e+00> : vector<8x128xf32>
    %32 = tpu.matmul %30, %31, %cst_20 {dimension_numbers = #tpu.dot_dimension_numbers<[1], [0], [0], [1], [0, 0, 1, 1], [], []>} : vector<8x128xf32>, vector<128x128xf32>, vector<8x128xf32> -> vector<8x128xf32>
    %c0_21 = arith.constant 0 : index
    %c0_22 = arith.constant 0 : index
    %33 = vector.load %arg9[%c0_21, %c0_22] : memref<1x128xf32, #tpu.memory_space<vmem>>, vector<1x128xf32>
    %34 = vector.broadcast %33 : vector<1x128xf32> to vector<8x128xf32>
    %35 = arith.addf %32, %34 : vector<8x128xf32>
    %c0_23 = arith.constant 0 : index
    %c0_24 = arith.constant 0 : index
    %36 = vector.load %arg10[%c0_23, %c0_24] : memref<8x128xf32, #tpu.memory_space<vmem>>, vector<8x128xf32>
    tpu.vector_store %arg10[%c0_23, %c0_24], %35 {strides = array<i32>} : memref<8x128xf32, #tpu.memory_space<vmem>>, vector<8x128xf32>,
    return
  }
  func.func @transform_0(%arg0: i32) -> (i32, i32) {
    %c0_i32 = arith.constant 0 : i32
    %c0_i32_0 = arith.constant 0 : i32
    return %arg0, %c0_i32 : i32, i32
  }
  func.func @transform_1(%arg0: i32) -> (i32, i32) {
    %c0_i32 = arith.constant 0 : i32
    %c0_i32_0 = arith.constant 0 : i32
    %c0_i32_1 = arith.constant 0 : i32
    return %c0_i32, %c0_i32_0 : i32, i32
  }
  func.func @transform_2(%arg0: i32) -> (i32, i32) {
    %c0_i32 = arith.constant 0 : i32
    %c0_i32_0 = arith.constant 0 : i32
    %c0_i32_1 = arith.constant 0 : i32
    return %c0_i32, %c0_i32_0 : i32, i32
  }
  func.func @transform_3(%arg0: i32) -> (i32, i32) {
    %c0_i32 = arith.constant 0 : i32
    %c0_i32_0 = arith.constant 0 : i32
    %c0_i32_1 = arith.constant 0 : i32
    return %c0_i32, %c0_i32_0 : i32, i32
  }
  func.func @transform_4(%arg0: i32) -> (i32, i32) {
    %c0_i32 = arith.constant 0 : i32
    %c0_i32_0 = arith.constant 0 : i32
    %c0_i32_1 = arith.constant 0 : i32
    return %c0_i32, %c0_i32_0 : i32, i32
  }
  func.func @transform_5(%arg0: i32) -> (i32, i32) {
    %c0_i32 = arith.constant 0 : i32
    %c0_i32_0 = arith.constant 0 : i32
    %c0_i32_1 = arith.constant 0 : i32
    return %c0_i32, %c0_i32_0 : i32, i32
  }
  func.func @transform_6(%arg0: i32) -> (i32, i32) {
    %c0_i32 = arith.constant 0 : i32
    %c0_i32_0 = arith.constant 0 : i32
    %c0_i32_1 = arith.constant 0 : i32
    return %c0_i32, %c0_i32_0 : i32, i32
  }
  func.func @transform_7(%arg0: i32) -> (i32, i32) {
    %c0_i32 = arith.constant 0 : i32
    %c0_i32_0 = arith.constant 0 : i32
    %c0_i32_1 = arith.constant 0 : i32
    return %c0_i32, %c0_i32_0 : i32, i32
  }
  func.func @transform_8(%arg0: i32) -> (i32, i32) {
    %c0_i32 = arith.constant 0 : i32
    %c0_i32_0 = arith.constant 0 : i32
    %c0_i32_1 = arith.constant 0 : i32
    return %c0_i32, %c0_i32_0 : i32, i32
  }
  func.func @transform_9(%arg0: i32) -> (i32, i32) {
    %c0_i32 = arith.constant 0 : i32
    %c0_i32_0 = arith.constant 0 : i32
    return %arg0, %c0_i32 : i32, i32
  }
}

</mosaic_0001>

<bundles_post_ra>
// kernel: tpu_custom_call.1
= control target key start
LH: loop header
LB: loop body
LE: loop exit
PB: predicated region body
PF: predicated region fallthrough
CT: control target
= control target key end

     0   :  { %14 = vsyncpa [#allocation3], 0  ;;  %s1613_s0 = inlined_call_operand.hbm [shape: f32[8,784], index: 0, kind: input, shape index: {}]   ;;  %s1614_s1 = inlined_call_operand.hbm [shape: f32[784,128], index: 1, kind: input, shape index: {}]   ;;  %s1615_s2 = inlined_call_operand.vmem [shape: f32[1,128], index: 2, kind: input, shape index: {}]   ;;  %s1616_s3 = inlined_call_operand.hbm [shape: f32[128,128], index: 3, kind: input, shape index: {}]   ;;  %s1617_s4 = inlined_call_operand.vmem [shape: f32[1,128], index: 4, kind: input, shape index: {}]   ;;  %s1618_s5 = inlined_call_operand.hbm [shape: f32[128,128], index: 5, kind: input, shape index: {}]   ;;  %s1619_s6 = inlined_call_operand.vmem [shape: f32[1,128], index: 6, kind: input, shape index: {}]   ;;  %s1620_s7 = inlined_call_operand.hbm [shape: f32[128,128], index: 7, kind: input, shape index: {}]   ;;  %s1621_s8 = inlined_call_operand.vmem [shape: f32[1,128], index: 8, kind: input, shape index: {}]   ;;  %s1622_s9 = inlined_call_operand.hbm [shape: f32[8,128], index: 9, kind: output, shape index: {}]  }
   0x1   :  { %15 = vsyncpa [#allocation6], 0 }
   0x2   :  { %16 = vsyncpa [#allocation9], 0 }
   0x3   :  { %17 = vsyncpa [#allocation4], 0  ;;  %s1423_s30 = smov [#allocation5]   ;;  %s1283_s13 = scalar_lea.hbm %s1614_s1, 12544 }
   0x4   :  { %s33_s10 = sshll.u32 %s1423_s30, 4  ;;  %p1284_p0 = scmp.ne.s32.totalorder %s1614_s1, %s1283_s13  ;;  %s34_s10 = int_to_ptr.vmem [resolvable:$true] %s33_s10 }
   0x5   :  { %p1287_p1 = scmp.lt.u32.totalorder %s1283_s13, %s1614_s1 }
   0x7   :  { %p1289_p2 = pnand %p1287_p1, %p1284_p0 }
   0x9   :  { %1292 = shalt.err (!%p1289_p2)
}
   0xa   :  { %s1293_s18 = scalar_lea.vmem %s34_s10, 12544  ;;  %p1298_p4 = scmp.lt.s32.totalorder %s34_s10, %s34_s10 }
   0xb   :  { %p1294_p3 = scmp.ne.s32.totalorder %s34_s10, %s1293_s18  ;;  %p1299_p5 = scmp.lt.s32.totalorder %s1293_s18, %s1293_s18 }
   0xd   :  { %p1300_p6 = por %p1299_p5, %p1298_p4 }
   0xf   :  { %p1301_p7 = pnand %p1300_p6, %p1294_p3 }
  0x11   :  { %1304 = shalt.err (!%p1301_p7)
}
  0x12   :  { %s1424_s19 = smov 128   ;;  %s1425_s20 = smov 8  }
  0x13   :  { %39 = dma.hbm_to_vmem [thread:$0]  %s1614_s1, 12544, %s34_s10, [#allocation6], %s1424_s19, %s1424_s19, %s1425_s20  }
  0x14   :  { %s1426_s23 = smov [#allocation8]   ;;  %s1427_s25 = smov [#allocation2]  }
  0x15   :  { %s61_s24 = sshll.u32 %s1426_s23, 4  ;;  %s24_s26 = sshll.u32 %s1427_s25, 4  ;;  %s62_s24 = int_to_ptr.vmem [resolvable:$true] %s61_s24  ;;  %s25_s26 = int_to_ptr.vmem [resolvable:$true] %s24_s26 }
  0x16   :  { %s1305_s29 = scalar_lea.hbm %s1618_s5, 2048 }
  0x17   :  { %p1306_p8 = scmp.ne.s32.totalorder %s1618_s5, %s1305_s29  ;;  %p1309_p9 = scmp.lt.u32.totalorder %s1305_s29, %s1618_s5 }
  0x19   :  { %p1311_p10 = pnand %p1309_p9, %p1306_p8 }
  0x1b   :  { %1314 = shalt.err (!%p1311_p10)
}
  0x1c   :  { %s1315_s1 = scalar_lea.vmem %s62_s24, 2048  ;;  %p1320_p12 = scmp.lt.s32.totalorder %s62_s24, %s62_s24 }
  0x1d   :  { %p1316_p11 = scmp.ne.s32.totalorder %s62_s24, %s1315_s1  ;;  %p1321_p13 = scmp.lt.s32.totalorder %s1315_s1, %s1315_s1 }
  0x1f   :  { %p1322_p0 = por %p1321_p13, %p1320_p12 }
  0x21   :  { %p1323_p1 = pnand %p1322_p0, %p1316_p11 }
  0x23   :  { %1326 = shalt.err (!%p1323_p1)
}
  0x24   :  { %67 = dma.hbm_to_vmem [thread:$0]  %s1618_s5, 2048, %s62_s24, [#allocation9], %s1424_s19, %s1424_s19, %s1425_s20  }
  0x25   :  { %s1327_s17 = scalar_lea.hbm %s1613_s0, 896 }
  0x26   :  { %p1328_p2 = scmp.ne.s32.totalorder %s1613_s0, %s1327_s17  ;;  %p1331_p3 = scmp.lt.u32.totalorder %s1327_s17, %s1613_s0 }
  0x28   :  { %p1333_p4 = pnand %p1331_p3, %p1328_p2 }
  0x2a   :  { %1336 = shalt.err (!%p1333_p4)
}
  0x2b   :  { %s1337_s25 = scalar_lea.vmem %s25_s26, 896  ;;  %p1342_p6 = scmp.lt.s32.totalorder %s25_s26, %s25_s26 }
  0x2c   :  { %p1338_p5 = scmp.ne.s32.totalorder %s25_s26, %s1337_s25  ;;  %p1343_p7 = scmp.lt.s32.totalorder %s1337_s25, %s1337_s25 }
  0x2e   :  { %p1344_p8 = por %p1343_p7, %p1342_p6 }
  0x30   :  { %p1345_p9 = pnand %p1344_p8, %p1338_p5 }
  0x32   :  { %1348 = shalt.err (!%p1345_p9)
}
  0x33   :  { %27 = dma.hbm_to_vmem [thread:$0]  %s1613_s0, 896, %s25_s26, [#allocation3]  }
  0x34   :  { %s1428_s27 = smov [#allocation7]   ;;  %s1429_s29 = smov [#allocation10]  }
  0x35   :  { %s47_s28 = sshll.u32 %s1428_s27, 4  ;;  %s75_s30 = sshll.u32 %s1429_s29, 4  ;;  %s48_s28 = int_to_ptr.vmem [resolvable:$true] %s47_s28  ;;  %s76_s30 = int_to_ptr.vmem [resolvable:$true] %s75_s30 }
  0x36   :  { %s1349_s13 = scalar_lea.hbm %s1616_s3, 2048 }
  0x37   :  { %p1350_p10 = scmp.ne.s32.totalorder %s1616_s3, %s1349_s13  ;;  %p1353_p11 = scmp.lt.u32.totalorder %s1349_s13, %s1616_s3 }
  0x39   :  { %p1355_p12 = pnand %p1353_p11, %p1350_p10 }
  0x3b   :  { %1358 = shalt.err (!%p1355_p12)
}
  0x3c   :  { %s1359_s0 = scalar_lea.vmem %s48_s28, 2048  ;;  %p1364_p0 = scmp.lt.s32.totalorder %s48_s28, %s48_s28 }
  0x3d   :  { %p1360_p13 = scmp.ne.s32.totalorder %s48_s28, %s1359_s0  ;;  %p1365_p1 = scmp.lt.s32.totalorder %s1359_s0, %s1359_s0 }
  0x3f   :  { %p1366_p2 = por %p1365_p1, %p1364_p0 }
  0x41   :  { %p1367_p3 = pnand %p1366_p2, %p1360_p13 }
  0x43   :  { %1370 = shalt.err (!%p1367_p3)
}
  0x44   :  { %53 = dma.hbm_to_vmem [thread:$0]  %s1616_s3, 2048, %s48_s28, [#allocation6], %s1424_s19, %s1424_s19, %s1425_s20  }
  0x45   :  { %s1371_s21 = scalar_lea.hbm %s1620_s7, 2048 }
  0x46   :  { %p1372_p4 = scmp.ne.s32.totalorder %s1620_s7, %s1371_s21  ;;  %p1375_p5 = scmp.lt.u32.totalorder %s1371_s21, %s1620_s7 }
  0x48   :  { %p1377_p6 = pnand %p1375_p5, %p1372_p4 }
  0x4a   :  { %1380 = shalt.err (!%p1377_p6)
}
  0x4b   :  { %s1381_s24 = scalar_lea.vmem %s76_s30, 2048  ;;  %p1386_p8 = scmp.lt.s32.totalorder %s76_s30, %s76_s30 }
  0x4c   :  { %p1382_p7 = scmp.ne.s32.totalorder %s76_s30, %s1381_s24  ;;  %p1387_p9 = scmp.lt.s32.totalorder %s1381_s24, %s1381_s24 }
  0x4e   :  { %p1388_p10 = por %p1387_p9, %p1386_p8 }
  0x50   :  { %p1389_p11 = pnand %p1388_p10, %p1382_p7 }
  0x52   :  { %1392 = shalt.err (!%p1389_p11)
}
  0x53   :  { %81 = dma.hbm_to_vmem [thread:$0]  %s1620_s7, 2048, %s76_s30, [#allocation9], %s1424_s19, %s1424_s19, %s1425_s20  }
  0x54   :  { %1415 = dma.done.wait [#allocation3], 896  }
  0x55   :  { %1416 = vsyncadd [#allocation3], 4294966400 }
  0x56   :  { %1417 = dma.done.wait [#allocation6], 14592  }
  0x57   :  { %1418 = vsyncadd [#allocation6], 4294952704 }
  0x58   :  { %1419 = dma.done.wait [#allocation9], 4096  }
  0x59   :  { %1420 = vsyncadd [#allocation9], 4294963200  ;;  %v122_v0 = vld [vmem:[#allocation5 + $0x80] sm:$0xff]  ;;  %v123_v1 = vld [vmem:[#allocation5 + $0x88] sm:$0xff]  ;;  %vm1431_vm0 = vmmov 0   ;;  %vm211_vm1 = vcmask 130048  }
  0x5a   :  { %v106_v2 = vld [vmem:[#allocation5] sm:$0xff]  ;;  %v1089_v3 = vpack.c.bf16 %v123_v1, %v122_v0  ;;  %v107_v4 = vld [vmem:[#allocation5 + $0x8] sm:$0xff]  ;;  %v124_v11 = vld [vmem:[#allocation5 + $0x90] sm:$0xff]  ;;  %s1433_s11 = smov [#allocation11]  }
  0x5b   :  { %v154_v5 = vld [vmem:[#allocation5 + $0x180] sm:$0xff]  ;;  %v155_v6 = vld [vmem:[#allocation5 + $0x188] sm:$0xff]  ;;  %v1091_v7 = vpack.c.bf16 %v107_v4, %v106_v2  ;;  %v125_v13 = vld [vmem:[#allocation5 + $0x98] sm:$0xff]  ;;  %s799_s12 = sshll.u32 %s1433_s11, 4  ;;  %s800_s12 = int_to_ptr.vmem [resolvable:$true] %s799_s12 }
  0x5c   :  { %v1121_v8 = vpack.c.bf16 %v155_v6, %v154_v5  ;;  %v138_v9 = vld [vmem:[#allocation5 + $0x100] sm:$0xff]  ;;  %v139_v10 = vld [vmem:[#allocation5 + $0x108] sm:$0xff]  ;;  %1090 = vmatprep.subr.bf16.mxu0 %v1089_v3  ;;  %v108_v14 = vld [vmem:[#allocation5 + $0x10] sm:$0xff]  ;;  %v1093_v16 = vpack.c.bf16 %v125_v13, %v124_v11  ;;  %p1398_p13 = scmp.lt.s32.totalorder %s800_s12, %s800_s12 }
  0x5d   :  { %v1123_v12 = vpack.c.bf16 %v139_v10, %v138_v9  ;;  %v109_v15 = vld [vmem:[#allocation5 + $0x18] sm:$0xff]  ;;  %1092 = vmatpush3.bf16.msra.mxu0 %v1091_v7  ;;  %v156_v18 = vld [vmem:[#allocation5 + $0x190] sm:$0xff]  ;;  %v126_v23 = vld [vmem:[#allocation5 + $0xa0] sm:$0xff] }
  0x5e   :  { %1122 = vmatprep.subr.bf16.mxu1 %v1121_v8  ;;  %v1095_v17 = vpack.c.bf16 %v109_v15, %v108_v14  ;;  %v157_v19 = vld [vmem:[#allocation5 + $0x198] sm:$0xff]  ;;  %v140_v20 = vld [vmem:[#allocation5 + $0x110] sm:$0xff]  ;;  %v127_v24 = vld [vmem:[#allocation5 + $0xa8] sm:$0xff]  ;;  %1094 = vmatprep.subr.bf16.mxu0 %v1093_v16 }
  0x5f   :  { %1124 = vmatpush3.bf16.msra.mxu1 %v1123_v12  ;;  %v1125_v21 = vpack.c.bf16 %v157_v19, %v156_v18  ;;  %v141_v22 = vld [vmem:[#allocation5 + $0x118] sm:$0xff]  ;;  %v1097_v26 = vpack.c.bf16 %v127_v24, %v126_v23  ;;  %v110_v27 = vld [vmem:[#allocation5 + $0x20] sm:$0xff]  ;;  %v111_v28 = vld [vmem:[#allocation5 + $0x28] sm:$0xff] }
  0x60   :  { %v1127_v25 = vpack.c.bf16 %v141_v22, %v140_v20  ;;  %v158_v29 = vld [vmem:[#allocation5 + $0x1a0] sm:$0xff]  ;;  %v159_v30 = vld [vmem:[#allocation5 + $0x1a8] sm:$0xff]  ;;  %v1099_v33 = vpack.c.bf16 %v111_v28, %v110_v27  ;;  %v128_v35 = vld [vmem:[#allocation5 + $0xb0] sm:$0xff] }
  0x61   :  { %1126 = vmatprep.subr.bf16.mxu1 %v1125_v21  ;;  %v142_v31 = vld [vmem:[#allocation5 + $0x120] sm:$0xff]  ;;  %v143_v32 = vld [vmem:[#allocation5 + $0x128] sm:$0xff]  ;;  %1096 = vmatpush3.bf16.msra.mxu0 %v1095_v17  ;;  %v1129_v34 = vpack.c.bf16 %v159_v30, %v158_v29  ;;  %v129_v36 = vld [vmem:[#allocation5 + $0xb8] sm:$0xff] }
  0x62   :  { %v112_v37 = vld [vmem:[#allocation5 + $0x30] sm:$0xff]  ;;  %1098 = vmatprep.subr.bf16.mxu0 %v1097_v26  ;;  %v1131_v38 = vpack.c.bf16 %v143_v32, %v142_v31  ;;  %v1101_v39 = vpack.c.bf16 %v129_v36, %v128_v35  ;;  %v113_v40 = vld [vmem:[#allocation5 + $0x38] sm:$0xff]  ;;  %v130_v46 = vld [vmem:[#allocation5 + $0xc0] sm:$0xff] }
  0x63   :  { %1128 = vmatpush3.bf16.msra.mxu1 %v1127_v25  ;;  %v160_v41 = vld [vmem:[#allocation5 + $0x1b0] sm:$0xff]  ;;  %v161_v42 = vld [vmem:[#allocation5 + $0x1b8] sm:$0xff]  ;;  %v131_v47 = vld [vmem:[#allocation5 + $0xc8] sm:$0xff]  ;;  %v1103_v48 = vpack.c.bf16 %v113_v40, %v112_v37 }
  0x64   :  { %1130 = vmatprep.subr.bf16.mxu1 %v1129_v34  ;;  %v1133_v43 = vpack.c.bf16 %v161_v42, %v160_v41  ;;  %v144_v44 = vld [vmem:[#allocation5 + $0x130] sm:$0xff]  ;;  %v145_v45 = vld [vmem:[#allocation5 + $0x138] sm:$0xff]  ;;  %v162_v49 = vld [vmem:[#allocation5 + $0x1c0] sm:$0xff]  ;;  %v1105_v52 = vpack.c.bf16 %v131_v47, %v130_v46 }
  0x65   :  { %1100 = vmatpush3.bf16.msra.mxu0 %v1099_v33  ;;  %v163_v50 = vld [vmem:[#allocation5 + $0x1c8] sm:$0xff]  ;;  %v1135_v51 = vpack.c.bf16 %v145_v45, %v144_v44  ;;  %v114_v53 = vld [vmem:[#allocation5 + $0x40] sm:$0xff]  ;;  %v132_v58 = vld [vmem:[#allocation5 + $0xd0] sm:$0xff] }
  0x66   :  { %1102 = vmatprep.subr.bf16.mxu0 %v1101_v39  ;;  %v115_v54 = vld [vmem:[#allocation5 + $0x48] sm:$0xff]  ;;  %v146_v55 = vld [vmem:[#allocation5 + $0x140] sm:$0xff]  ;;  %v1137_v56 = vpack.c.bf16 %v163_v50, %v162_v49  ;;  %v133_v59 = vld [vmem:[#allocation5 + $0xd8] sm:$0xff]  ;;  %v1430_v50 = vmov 0.0|0.0  }
  0x67   :  { %1132 = vmatpush3.bf16.msra.mxu1 %v1131_v38  ;;  %v147_v57 = vld [vmem:[#allocation5 + $0x148] sm:$0xff]  ;;  %v164_v60 = vld [vmem:[#allocation5 + $0x1d0] sm:$0xff]  ;;  %v165_v61 = vld [vmem:[#allocation5 + $0x1d8] sm:$0xff]  ;;  %v1107_v62 = vpack.c.bf16 %v115_v54, %v114_v53  ;;  %v1109_v0 = vpack.c.bf16 %v133_v59, %v132_v58 }
  0x68   :  { %1134 = vmatprep.subr.bf16.mxu1 %v1133_v43  ;;  %v1139_v63 = vpack.c.bf16 %v147_v57, %v146_v55  ;;  %v116_v1 = vld [vmem:[#allocation5 + $0x50] sm:$0xff]  ;;  %v117_v2 = vld [vmem:[#allocation5 + $0x58] sm:$0xff]  ;;  %v1141_v4 = vpack.c.bf16 %v165_v61, %v164_v60  ;;  %v134_v6 = vld [vmem:[#allocation5 + $0xe0] sm:$0xff]  ;;  %v1432_v60 = vmov 0.0  }
  0x69   :  { %1104 = vmatpush3.bf16.msra.mxu0 %v1103_v48  ;;  %v148_v3 = vld [vmem:[#allocation5 + $0x150] sm:$0xff]  ;;  %v149_v5 = vld [vmem:[#allocation5 + $0x158] sm:$0xff]  ;;  %v135_v7 = vld [vmem:[#allocation5 + $0xe8] sm:$0xff]  ;;  %v1111_v10 = vpack.c.bf16 %v117_v2, %v116_v1 }
  0x6a   :  { %1106 = vmatprep.subr.bf16.mxu0 %v1105_v52  ;;  %v166_v8 = vld [vmem:[#allocation5 + $0x1e0] sm:$0xff]  ;;  %v167_v9 = vld [vmem:[#allocation5 + $0x1e8] sm:$0xff]  ;;  %v100_v12 = vld [vmem:[#allocation2 + $0x8] sm:$0xff]  ;;  %v1143_v13 = vpack.c.bf16 %v149_v5, %v148_v3  ;;  %v1113_v14 = vpack.c.bf16 %v135_v7, %v134_v6 }
  0x6b   :  { %1136 = vmatpush3.bf16.msra.mxu1 %v1135_v51  ;;  %v118_v11 = vld [vmem:[#allocation5 + $0x60] sm:$0xff]  ;;  %v119_v15 = vld [vmem:[#allocation5 + $0x68] sm:$0xff]  ;;  %v1145_v18 = vpack.c.bf16 %v167_v9, %v166_v8  ;;  %v136_v19 = vld [vmem:[#allocation5 + $0xf0] sm:$0xff]  ;;  %279 = vmatprep.mubr.f32.mxu0 %v100_v12 }
  0x6c   :  { %1138 = vmatprep.subr.bf16.mxu1 %v1137_v56  ;;  %v150_v16 = vld [vmem:[#allocation5 + $0x160] sm:$0xff]  ;;  %v151_v17 = vld [vmem:[#allocation5 + $0x168] sm:$0xff]  ;;  %v137_v20 = vld [vmem:[#allocation5 + $0xf8] sm:$0xff]  ;;  %v1115_v24 = vpack.c.bf16 %v119_v15, %v118_v11 }
  0x6d   :  { %1108 = vmatpush3.bf16.msra.mxu0 %v1107_v62  ;;  %v102_v21 = vld [vmem:[#allocation2 + $0x18] sm:$0xff]  ;;  %v168_v22 = vld [vmem:[#allocation5 + $0x1f0] sm:$0xff]  ;;  %v169_v23 = vld [vmem:[#allocation5 + $0x1f8] sm:$0xff]  ;;  %v1147_v25 = vpack.c.bf16 %v151_v17, %v150_v16  ;;  %v1117_v26 = vpack.c.bf16 %v137_v20, %v136_v19 }
  0x6e   :  { %1110 = vmatprep.subr.bf16.mxu0 %v1109_v0  ;;  %349 = vmatprep.mubr.f32.mxu1 %v102_v21  ;;  %v120_v27 = vld [vmem:[#allocation5 + $0x70] sm:$0xff]  ;;  %v121_v28 = vld [vmem:[#allocation5 + $0x78] sm:$0xff]  ;;  %v1149_v30 = vpack.c.bf16 %v169_v23, %v168_v22  ;;  %v186_v32 = vld [vmem:[#allocation5 + $0x280] sm:$0xff] }
  0x6f   :  { %1140 = vmatpush3.bf16.msra.mxu1 %v1139_v63  ;;  %v152_v29 = vld [vmem:[#allocation5 + $0x170] sm:$0xff]  ;;  %v153_v31 = vld [vmem:[#allocation5 + $0x178] sm:$0xff]  ;;  %v187_v33 = vld [vmem:[#allocation5 + $0x288] sm:$0xff]  ;;  %v1119_v34 = vpack.c.bf16 %v121_v28, %v120_v27 }
  0x70   :  { %1142 = vmatprep.subr.bf16.mxu1 %v1141_v4  ;;  %v1151_v35 = vpack.c.bf16 %v153_v31, %v152_v29  ;;  %v1153_v36 = vpack.c.bf16 %v187_v33, %v186_v32  ;;  %v170_v37 = vld [vmem:[#allocation5 + $0x200] sm:$0xff]  ;;  %v171_v38 = vld [vmem:[#allocation5 + $0x208] sm:$0xff]  ;;  %v188_v39 = vld [vmem:[#allocation5 + $0x290] sm:$0xff] }
  0x71   :  { %1112 = vmatpush3.bf16.msra.mxu0 %v1111_v10  ;;  %v189_v40 = vld [vmem:[#allocation5 + $0x298] sm:$0xff]  ;;  %v99_v41 = vld [vmem:[#allocation2] sm:$0xff]  ;;  %v1155_v42 = vpack.c.bf16 %v171_v38, %v170_v37  ;;  %v172_v44 = vld [vmem:[#allocation5 + $0x210] sm:$0xff] }
  0x72   :  { %1114 = vmatprep.subr.bf16.mxu0 %v1113_v14  ;;  %v101_v43 = vld [vmem:[#allocation2 + $0x10] sm:$0xff]  ;;  %v1157_v45 = vpack.c.bf16 %v189_v40, %v188_v39  ;;  %v190_v47 = vld [vmem:[#allocation5 + $0x2a0] sm:$0xff]  ;;  %v191_v48 = vld [vmem:[#allocation5 + $0x2a8] sm:$0xff] }
  0x73   :  { %1144 = vmatpush3.bf16.msra.mxu1 %v1143_v13  ;;  %v173_v46 = vld [vmem:[#allocation5 + $0x218] sm:$0xff]  ;;  %v104_v49 = vld [vmem:[#allocation2 + $0x28] sm:$0xff]  ;;  %v202_v51 = vld [vmem:[#allocation5 + $0x300] sm:$0xff]  ;;  %v1161_v55 = vpack.c.bf16 %v191_v48, %v190_v47 }
  0x74   :  { %1146 = vmatprep.subr.bf16.mxu1 %v1145_v18  ;;  %v203_v52 = vld [vmem:[#allocation5 + $0x308] sm:$0xff]  ;;  %v1159_v54 = vpack.c.bf16 %v173_v46, %v172_v44  ;;  %v174_v56 = vld [vmem:[#allocation5 + $0x220] sm:$0xff]  ;;  %v192_v58 = vld [vmem:[#allocation5 + $0x2b0] sm:$0xff] }
  0x75   :  { %1116 = vmatpush3.bf16.msra.mxu0 %v1115_v24  ;;  %v1186_v53 = vpack.c.bf16 %v203_v52, %v202_v51  ;;  %v175_v57 = vld [vmem:[#allocation5 + $0x228] sm:$0xff]  ;;  %v193_v59 = vld [vmem:[#allocation5 + $0x2b8] sm:$0xff]  ;;  %v176_v0 = vld [vmem:[#allocation5 + $0x230] sm:$0xff] }
  0x76   :  { %1118 = vmatprep.subr.bf16.mxu0 %v1117_v26  ;;  %v105_v61 = vld [vmem:[#allocation2 + $0x30] sm:$0xff]  ;;  %v1163_v62 = vpack.c.bf16 %v175_v57, %v174_v56  ;;  %v1165_v63 = vpack.c.bf16 %v193_v59, %v192_v58  ;;  %v194_v2 = vld [vmem:[#allocation5 + $0x2c0] sm:$0xff]  ;;  %v195_v3 = vld [vmem:[#allocation5 + $0x2c8] sm:$0xff] }
  0x77   :  { %1148 = vmatpush3.bf16.msra.mxu1 %v1147_v25  ;;  %v177_v1 = vld [vmem:[#allocation5 + $0x238] sm:$0xff]  ;;  %v1169_v5 = vpack.c.bf16 %v195_v3, %v194_v2  ;;  %v178_v6 = vld [vmem:[#allocation5 + $0x240] sm:$0xff]  ;;  %v179_v7 = vld [vmem:[#allocation5 + $0x248] sm:$0xff] }
  0x78   :  { %1150 = vmatprep.subr.bf16.mxu1 %v1149_v30  ;;  %v1167_v4 = vpack.c.bf16 %v177_v1, %v176_v0  ;;  %v196_v8 = vld [vmem:[#allocation5 + $0x2d0] sm:$0xff]  ;;  %v197_v9 = vld [vmem:[#allocation5 + $0x2d8] sm:$0xff]  ;;  %v1171_v10 = vpack.c.bf16 %v179_v7, %v178_v6  ;;  %v198_v14 = vld [vmem:[#allocation5 + $0x2e0] sm:$0xff] }
  0x79   :  { %1120 = vmatpush3.bf16.msra.mxu0 %v1119_v34  ;;  %v1173_v11 = vpack.c.bf16 %v197_v9, %v196_v8  ;;  %v180_v12 = vld [vmem:[#allocation5 + $0x250] sm:$0xff]  ;;  %v181_v13 = vld [vmem:[#allocation5 + $0x258] sm:$0xff]  ;;  %v199_v15 = vld [vmem:[#allocation5 + $0x2e8] sm:$0xff] }
  0x7a   :  { %1154 = vmatprep.subr.bf16.mxu0 %v1153_v36  ;;  %v1175_v16 = vpack.c.bf16 %v181_v13, %v180_v12  ;;  %v1177_v17 = vpack.c.bf16 %v199_v15, %v198_v14  ;;  %v182_v18 = vld [vmem:[#allocation5 + $0x260] sm:$0xff]  ;;  %v183_v19 = vld [vmem:[#allocation5 + $0x268] sm:$0xff]  ;;  %v200_v20 = vld [vmem:[#allocation5 + $0x2f0] sm:$0xff] }
  0x7b   :  { %1152 = vmatpush3.bf16.msra.mxu1 %v1151_v35  ;;  %v201_v21 = vld [vmem:[#allocation5 + $0x2f8] sm:$0xff]  ;;  %v1179_v22 = vpack.c.bf16 %v183_v19, %v182_v18  ;;  %v184_v24 = vld [vmem:[#allocation5 + $0x270] sm:$0xff]  ;;  %v103_v27 = vld [vmem:[#allocation2 + $0x20] sm:$0xff] }
  0x7c   :  { %1185 = vmatprep.subr.bf16.mxu1 %v1430_v50  ;;  %280 = vmatmul.mubr.f32.vlgmr.msra.gmra.mrb[0].mxu0 %v99_v41  ;;  %v1181_v23 = vpack.c.bf16 %v201_v21, %v200_v20  ;;  %v185_v25 = vld [vmem:[#allocation5 + $0x278] sm:$0xff]  ;;  %v501_v28 = vld [vmem:[#allocation7] sm:$0xff]  ;;  %v503_v31 = vld [vmem:[#allocation7 + $0x10] sm:$0xff] }
  0x7d   :  { %1156 = vmatpush3.bf16.msra.mxu0 %v1155_v42  ;;  %419 = vmatprep.mubr.f32.mxu0 %v104_v49  ;;  %v1183_v26 = vpack.c.bf16 %v185_v25, %v184_v24  ;;  %v502_v29 = vld [vmem:[#allocation7 + $0x8] sm:$0xff]  ;;  %v504_v32 = vld [vmem:[#allocation7 + $0x18] sm:$0xff]  ;;  %v505_v34 = vld [vmem:[#allocation7 + $0x20] sm:$0xff] }
  0x7e   :  { %350 = vmatmul.mubr.f32.vlgmr.msra.gmra.mrb[0].mxu1 %v101_v43  ;;  %1158 = vmatprep.subr.bf16.mxu0 %v1157_v45  ;;  %v1189_v30 = vpack.c.bf16 %v502_v29, %v501_v28  ;;  %v1192_v33 = vpack.c.bf16 %v504_v32, %v503_v31  ;;  %v506_v35 = vld [vmem:[#allocation7 + $0x28] sm:$0xff]  ;;  %v507_v37 = vld [vmem:[#allocation7 + $0x30] sm:$0xff]  ;;  %v508_v38 = vld [vmem:[#allocation7 + $0x38] sm:$0xff] }
  0x7f   :  { %1187 = vmatpush3.bf16.msra.mxu1 %v1186_v53  ;;  %981 = vmatprep.mubr.msk.f32.mxu1 %vm1431_vm0, %v1432_v60  ;;  %v1195_v36 = vpack.c.bf16 %v506_v35, %v505_v34  ;;  %v1198_v39 = vpack.c.bf16 %v508_v38, %v507_v37  ;;  %v509_v40 = vld [vmem:[#allocation7 + $0x40] sm:$0xff]  ;;  %v510_v41 = vld [vmem:[#allocation7 + $0x48] sm:$0xff]  ;;  %v511_v43 = vld [vmem:[#allocation7 + $0x50] sm:$0xff] }
  0x80   :  { %1188 = vmatprep.subr.bf16.mxu1 %v1430_v50  ;;  %v1201_v42 = vpack.c.bf16 %v510_v41, %v509_v40  ;;  %v512_v44 = vld [vmem:[#allocation7 + $0x58] sm:$0xff]  ;;  %v513_v46 = vld [vmem:[#allocation7 + $0x60] sm:$0xff]  ;;  %v514_v47 = vld [vmem:[#allocation7 + $0x68] sm:$0xff] }
  0x81   :  { %1160 = vmatpush3.bf16.msra.mxu0 %v1159_v54  ;;  %v1204_v45 = vpack.c.bf16 %v512_v44, %v511_v43  ;;  %v1207_v48 = vpack.c.bf16 %v514_v47, %v513_v46  ;;  %v515_v49 = vld [vmem:[#allocation7 + $0x70] sm:$0xff]  ;;  %v516_v51 = vld [vmem:[#allocation7 + $0x78] sm:$0xff]  ;;  %v600_v53 = vld [vmem:[#allocation8] sm:$0xff] }
  0x82   :  { %1162 = vmatprep.subr.bf16.mxu0 %v1161_v55  ;;  %982 = vmatmul.mubr.msk.f32.vlgmr.msra.gmra.mrb[2].mxu1 %vm211_vm1, %v105_v61  ;;  %v1210_v52 = vpack.c.bf16 %v516_v51, %v515_v49  ;;  %v601_v54 = vld [vmem:[#allocation8 + $0x8] sm:$0xff]  ;;  %v810_v57 = vld [vmem:[%s1615_s2] ss:$0 sm:$0xff]  ;;  %v602_v13 = vld [vmem:[#allocation8 + $0x10] sm:$0xff] }
  0x83   :  { %1016 = vmatprep.mubr.msk.f32.mxu1 %vm1431_vm0, %v1432_v60  ;;  %1190 = vmatpush3.bf16.msra.mxu1 %v1189_v30  ;;  %v1213_v55 = vpack.c.bf16 %v601_v54, %v600_v53  ;;  %v603_v14 = vld [vmem:[#allocation8 + $0x18] sm:$0xff]  ;;  %v606_v19 = vld [vmem:[#allocation8 + $0x30] sm:$0xff]  ;;  %v613_v28 = vld [vmem:[#allocation8 + $0x68] sm:$0xff] }
  0x84   :  { %1191 = vmatprep.subr.bf16.mxu1 %v1430_v50  ;;  %v1216_v15 = vpack.c.bf16 %v603_v14, %v602_v13  ;;  %v607_v20 = vld [vmem:[#allocation8 + $0x38] sm:$0xff]  ;;  %v610_v24 = vld [vmem:[#allocation8 + $0x50] sm:$0xff]  ;;  %v700_v34 = vld [vmem:[#allocation10 + $0x8] sm:$0xff] }
  0x85   :  { %1164 = vmatpush3.bf16.msra.mxu0 %v1163_v62  ;;  %v1222_v21 = vpack.c.bf16 %v607_v20, %v606_v19  ;;  %v611_v25 = vld [vmem:[#allocation8 + $0x58] sm:$0xff]  ;;  %v614_v30 = vld [vmem:[#allocation8 + $0x70] sm:$0xff]  ;;  %v703_v47 = vld [vmem:[#allocation10 + $0x20] sm:$0xff] }
  0x86   :  { %1166 = vmatprep.subr.bf16.mxu0 %v1165_v63  ;;  %v615_v31 = vld [vmem:[#allocation8 + $0x78] sm:$0xff]  ;;  %v701_v44 = vld [vmem:[#allocation10 + $0x10] sm:$0xff]  ;;  %v707_v54 = vld [vmem:[#allocation10 + $0x40] sm:$0xff] }
  0x87   :  { %1193 = vmatpush3.bf16.msra.mxu1 %v1192_v33  ;;  %v1234_v32 = vpack.c.bf16 %v615_v31, %v614_v30  ;;  %v699_v33 = vld [vmem:[#allocation10] sm:$0xff]  ;;  %v705_v51 = vld [vmem:[#allocation10 + $0x30] sm:$0xff] }
  0x88   :  { %1194 = vmatprep.subr.bf16.mxu1 %v1430_v50  ;;  %v1237_v35 = vpack.c.bf16 %v700_v34, %v699_v33 }
  0x89   :  { %1168 = vmatpush3.bf16.msra.mxu0 %v1167_v4 }
  0x8a   :  { %1170 = vmatprep.subr.bf16.mxu0 %v1169_v5 }
  0x8b   :  { %1196 = vmatpush3.bf16.msra.mxu1 %v1195_v36  ;;  %v813_v36 = vld [vmem:[%s1617_s4] ss:$0 sm:$0xff] }
  0x8c   :  { %1197 = vmatprep.subr.bf16.mxu1 %v1430_v50 }
  0x8d   :  { %1172 = vmatpush3.bf16.msra.mxu0 %v1171_v10 }
  0x8e   :  { %1174 = vmatprep.subr.bf16.mxu0 %v1173_v11 }
  0x8f   :  { %1199 = vmatpush3.bf16.msra.mxu1 %v1198_v39 }
  0x90   :  { %1200 = vmatprep.subr.bf16.mxu1 %v1430_v50 }
  0x91   :  { %1176 = vmatpush3.bf16.msra.mxu0 %v1175_v16  ;;  %v604_v16 = vld [vmem:[#allocation8 + $0x20] sm:$0xff] }
  0x92   :  { %1178 = vmatprep.subr.bf16.mxu0 %v1177_v17  ;;  %v605_v17 = vld [vmem:[#allocation8 + $0x28] sm:$0xff] }
  0x93   :  { %1202 = vmatpush3.bf16.msra.mxu1 %v1201_v42  ;;  %v1219_v18 = vpack.c.bf16 %v605_v17, %v604_v16 }
  0x94   :  { %1203 = vmatprep.subr.bf16.mxu1 %v1430_v50 }
  0x95   :  { %1180 = vmatpush3.bf16.msra.mxu0 %v1179_v22  ;;  %v608_v22 = vld [vmem:[#allocation8 + $0x40] sm:$0xff] }
  0x96   :  { %1182 = vmatprep.subr.bf16.mxu0 %v1181_v23 }
  0x97   :  { %1205 = vmatpush3.bf16.msra.mxu1 %v1204_v45  ;;  %v702_v45 = vld [vmem:[#allocation10 + $0x18] sm:$0xff] }
  0x98   :  { %1206 = vmatprep.subr.bf16.mxu1 %v1430_v50  ;;  %v1240_v46 = vpack.c.bf16 %v702_v45, %v701_v44 }
  0x99   :  { %1184 = vmatpush3.bf16.msra.mxu0 %v1183_v26  ;;  %v1228_v26 = vpack.c.bf16 %v611_v25, %v610_v24 }
  0x9a   :  { %1212 = vmatprep.subr.bf16.mxu0 %v1430_v50 }
  0x9b   :  { %1208 = vmatpush3.bf16.msra.mxu1 %v1207_v48  ;;  %v704_v48 = vld [vmem:[#allocation10 + $0x28] sm:$0xff] }
  0x9c   :  { %420 = vmatmul.mubr.f32.vlgmr.msra.gmra.mrb[2].mxu0 %v103_v27  ;;  %1209 = vmatprep.subr.bf16.mxu1 %v1430_v50  ;;  %v612_v27 = vld [vmem:[#allocation8 + $0x60] sm:$0xff]  ;;  %v1243_v49 = vpack.c.bf16 %v704_v48, %v703_v47 }
  0x9d   :  { %1051 = vmatprep.mubr.msk.f32.mxu0 %vm1431_vm0, %v1432_v60  ;;  %1214 = vmatpush3.bf16.msra.mxu0 %v1213_v55  ;;  %v1231_v29 = vpack.c.bf16 %v613_v28, %v612_v27  ;;  %v708_v55 = vld [vmem:[#allocation10 + $0x48] sm:$0xff] }
  0x9e   :  { %1215 = vmatprep.subr.bf16.mxu0 %v1430_v50 }
  0x9f   :  { %1211 = vmatpush3.bf16.msra.mxu1 %v1210_v52  ;;  %v706_v52 = vld [vmem:[#allocation10 + $0x38] sm:$0xff] }
  0xa0   :  { %1236 = vmatprep.subr.bf16.mxu1 %v1430_v50  ;;  %v1246_v53 = vpack.c.bf16 %v706_v52, %v705_v51 }
  0xa1   :  { %1217 = vmatpush3.bf16.msra.mxu0 %v1216_v15 }
  0xa2   :  { %1218 = vmatprep.subr.bf16.mxu0 %v1430_v50 }
  0xa5   :  { %1220 = vmatpush3.bf16.msra.mxu0 %v1219_v18 }
  0xa6   :  { %1221 = vmatprep.subr.bf16.mxu0 %v1430_v50 }
  0xa9   :  { %1223 = vmatpush3.bf16.msra.mxu0 %v1222_v21 }
  0xaa   :  { %1224 = vmatprep.subr.bf16.mxu0 %v1430_v50 }
 0x14f   :  { %v850_v56 = vpop.f32.mrb[0].mxu0 }
 0x150   :  { %v851_v58 = vpop.f32.mrb[1].mxu0 }
 0x151   :  { %v885_v59 = vpop.f32.mrb[0].mxu1  ;;  %v852_v61 = vadd.f32 %v851_v58, %v850_v56  ;;  %v1249_v56 = vpack.c.bf16 %v708_v55, %v707_v54  ;;  %v710_v58 = vld [vmem:[#allocation10 + $0x58] sm:$0xff] }
 0x152   :  { %v886_v62 = vpop.f32.mrb[1].mxu1 }
 0x153   :  { %v887_v63 = vadd.f32 %v886_v62, %v885_v59  ;;  %v282_v0 = vadd.f32 %v852_v61, %v810_v57  ;;  %v709_v57 = vld [vmem:[#allocation10 + $0x50] sm:$0xff]  ;;  %v711_v61 = vld [vmem:[#allocation10 + $0x60] sm:$0xff]  ;;  %v712_v62 = vld [vmem:[#allocation10 + $0x68] sm:$0xff] }
 0x154   :  { %v1252_v59 = vpack.c.bf16 %v710_v58, %v709_v57 }
 0x155   :  { %v352_v1 = vadd.f32 %v887_v63, %v282_v0  ;;  %v491_v2 = vpop.f32.mrb[2].mxu1  ;;  %v1255_v63 = vpack.c.bf16 %v712_v62, %v711_v61  ;;  %v713_v0 = vld [vmem:[#allocation10 + $0x70] sm:$0xff] }
 0x156   :  { %v983_v3 = vpop.f32.mrb[3].mxu1 }
 0x157   :  { %v815_v3 = vld [vmem:[%s1619_s6] ss:$0 sm:$0xff]  ;;  %s1393_s6 = scalar_lea.vmem %s800_s12, 128 }
 0x158   :  { %p1394_p12 = scmp.ne.s32.totalorder %s800_s12, %s1393_s6  ;;  %p1399_p0 = scmp.lt.s32.totalorder %s1393_s6, %s1393_s6 }
 0x15a   :  { %p1400_p1 = por %p1399_p0, %p1398_p13 }
 0x15c   :  { %p1401_p2 = pnand %p1400_p1, %p1394_p12 }
 0x16f   :  { %v920_v4 = vpop.f32.mrb[2].mxu0 }
 0x170   :  { %v921_v5 = vpop.f32.mrb[3].mxu0 }
 0x171   :  { %v922_v6 = vadd.f32 %v921_v5, %v920_v4 }
 0x173   :  { %v422_v7 = vadd.f32 %v922_v6, %v352_v1  ;;  %v714_v1 = vld [vmem:[#allocation10 + $0x78] sm:$0xff] }
 0x175   :  { %v492_v8 = vadd.f32 %v491_v2, %v422_v7  ;;  %v1258_v2 = vpack.c.bf16 %v714_v1, %v713_v0 }
 0x177   :  { %v812_v9 = vmul.f32 -1.442695, %v492_v8 }
 0x179   :  { %1271 = vpow2.f32 %v812_v9 }
 0x183   :  { %v1272_v10 = vpop.eup %1271 }
 0x184   :  { %v498_v11 = vadd.f32 1.0, %v1272_v10 }
 0x186   :  { %1273 = vrcp.f32 %v498_v11  ;;  %v817_v11 = vld [vmem:[%s1621_s8] ss:$0 sm:$0xff] }
 0x190   :  { %v1274_v12 = vpop.eup %1273 }
 0x191   :  { %1017 = vmatmul.mubr.f32.vlgmr.msra.gmra.mrb[4].mxu1 %v1274_v12 }
 0x192   :  { %1086 = vmatprep.mubr.msk.f32.mxu1 %vm1431_vm0, %v1432_v60  ;;  %v609_v60 = vld [vmem:[#allocation8 + $0x48] sm:$0xff]  ;;  %1238 = vmatpush3.bf16.msra.mxu1 %v1237_v35 }
 0x193   :  { %v1225_v23 = vpack.c.bf16 %v609_v60, %v608_v22  ;;  %1239 = vmatprep.subr.bf16.mxu1 %v1430_v50 }
 0x195   :  { %1226 = vmatpush3.bf16.msra.mxu0 %v1225_v23 }
 0x196   :  { %1227 = vmatprep.subr.bf16.mxu0 %v1430_v50  ;;  %1241 = vmatpush3.bf16.msra.mxu1 %v1240_v46 }
 0x197   :  { %1242 = vmatprep.subr.bf16.mxu1 %v1430_v50 }
 0x199   :  { %1229 = vmatpush3.bf16.msra.mxu0 %v1228_v26 }
 0x19a   :  { %1230 = vmatprep.subr.bf16.mxu0 %v1430_v50  ;;  %1244 = vmatpush3.bf16.msra.mxu1 %v1243_v49 }
 0x19b   :  { %1245 = vmatprep.subr.bf16.mxu1 %v1430_v50 }
 0x19d   :  { %1232 = vmatpush3.bf16.msra.mxu0 %v1231_v29 }
 0x19e   :  { %1233 = vmatprep.subr.bf16.mxu0 %v1430_v50  ;;  %1247 = vmatpush3.bf16.msra.mxu1 %v1246_v53 }
 0x19f   :  { %1248 = vmatprep.subr.bf16.mxu1 %v1430_v50 }
 0x1a1   :  { %1235 = vmatpush3.bf16.msra.mxu0 %v1234_v32 }
 0x1a2   :  { %1250 = vmatpush3.bf16.msra.mxu1 %v1249_v56 }
 0x1a3   :  { %1251 = vmatprep.subr.bf16.mxu1 %v1430_v50 }
 0x1a6   :  { %1253 = vmatpush3.bf16.msra.mxu1 %v1252_v59 }
 0x1a7   :  { %1254 = vmatprep.subr.bf16.mxu1 %v1430_v50 }
 0x1aa   :  { %1256 = vmatpush3.bf16.msra.mxu1 %v1255_v63 }
 0x1ab   :  { %1257 = vmatprep.subr.bf16.mxu1 %v1430_v50 }
 0x1ae   :  { %1259 = vmatpush3.bf16.msra.mxu1 %v1258_v2 }
 0x264   :  { %v590_v37 = vpop.f32.mrb[4].mxu1 }
 0x265   :  { %v591_v38 = vadd.f32 %v813_v36, %v590_v37  ;;  %v1018_v39 = vpop.f32.mrb[5].mxu1 }
 0x267   :  { %v814_v40 = vmul.f32 -1.442695, %v591_v38 }
 0x269   :  { %1275 = vpow2.f32 %v814_v40 }
 0x273   :  { %v1276_v41 = vpop.eup %1275 }
 0x274   :  { %v597_v42 = vadd.f32 1.0, %v1276_v41 }
 0x276   :  { %1277 = vrcp.f32 %v597_v42 }
 0x280   :  { %v1278_v43 = vpop.eup %1277 }
 0x281   :  { %1052 = vmatmul.mubr.f32.vlgmr.msra.gmra.mrb[4].mxu0 %v1278_v43 }
 0x354   :  { %v689_v4 = vpop.f32.mrb[4].mxu0 }
 0x355   :  { %v690_v5 = vadd.f32 %v815_v3, %v689_v4  ;;  %v1053_v6 = vpop.f32.mrb[5].mxu0 }
 0x357   :  { %v816_v7 = vmul.f32 -1.442695, %v690_v5 }
 0x359   :  { %1279 = vpow2.f32 %v816_v7 }
 0x363   :  { %v1280_v8 = vpop.eup %1279 }
 0x364   :  { %v696_v9 = vadd.f32 1.0, %v1280_v8 }
 0x366   :  { %1281 = vrcp.f32 %v696_v9 }
 0x370   :  { %v1282_v10 = vpop.eup %1281 }
 0x371   :  { %1087 = vmatmul.mubr.f32.vlgmr.msra.gmra.mrb[6].mxu1 %v1282_v10 }
 0x444   :  { %v788_v50 = vpop.f32.mrb[6].mxu1 }
 0x445   :  { %v789_v12 = vadd.f32 %v817_v11, %v788_v50  ;;  %v1088_v13 = vpop.f32.mrb[7].mxu1 }
 0x447   :  { %792 = vst [vmem:[#allocation11] sm:$0xff] %v789_v12 }
 0x448   :  { %1404 = shalt.err (!%p1401_p2)
}
 0x449   :  { %s1405_s10 = scalar_lea.hbm %s1622_s9, 128 }
 0x44a   :  { %p1406_p3 = scmp.ne.s32.totalorder %s1622_s9, %s1405_s10  ;;  %p1409_p4 = scmp.lt.u32.totalorder %s1405_s10, %s1622_s9 }
 0x44c   :  { %p1411_p5 = pnand %p1409_p4, %p1406_p3 }
 0x44e   :  { %1414 = shalt.err (!%p1411_p5)
}
 0x44f   :  { %802 = dma.vmem_to_hbm [thread:$0]  %s800_s12, 128, %s1622_s9, [#allocation4]  }
 0x450   :  { %1421 = dma.done.wait [#allocation4], 128  }
 0x451   :  { %1422 = vsyncadd [#allocation4], 4294967168 }
 0x452   :  { %806 = vsyncpa [#allocation3], 1 }
 0x453   :  { %807 = vsyncpa [#allocation6], 1 }
 0x454   :  { %808 = vsyncpa [#allocation9], 1 }
 0x455   :  { %809 = vsyncpa [#allocation4], 1 }

</bundles_post_ra>
